<compile_context>
chip_gen: v5e
topology: v5e:2x2
jax: 0.10.0
libtpu: 0.0.40
codegen_flags: <defaults>
</compile_context>

<pallas_src>
import functools
import math

import jax
import jax.numpy as jnp
from jax.experimental import pallas as pl
from jax.experimental.pallas import tpu as pltpu

F_PAD = 32      # common padded feature width for the packed weight slabs
N_SLABS = 3     # three Linear layers in the demo config


def _round_up(x, m):
    return (x + m - 1) // m * m


# ----------------------------------------------------------------------------
# Fused MLP kernel (one batch tile per grid step, weights resident in VMEM).
# ----------------------------------------------------------------------------
def _mlp_kernel(x_ref, w_ref, b_ref, out_ref, *, d_in):
    # x_ref  : (TB, d_in)          f32/bf16  batch tile (ragged last tile masked)
    # w_ref  : (3, F_PAD, F_PAD)   f32   [W1 | W2 (col-padded) | slab2 row0 = W3^T]
    # b_ref  : (3, F_PAD)          f32   [b1 | b2 (padded)     | [b3, 0, ...]]
    # out_ref: (TB, 1)             f32
    x = x_ref[...].astype(jnp.float32)

    # Layer 1: Linear + ReLU (MXU, f32 accumulate). Static K-slice of the
    # packed slab instead of padding x columns.
    w1 = w_ref[0, :d_in, :]                                    # (d_in, F_PAD)
    h1 = jnp.dot(x, w1, preferred_element_type=jnp.float32) + b_ref[0:1, :]
    h1 = jnp.maximum(h1, 0.0)

    # Layer 2: Linear + ReLU. Padded columns 16..31 of W2/b2 are zero, so the
    # padded lanes of h2 stay exactly zero after ReLU.
    h2 = jnp.dot(h1, w_ref[1], preferred_element_type=jnp.float32) + b_ref[1:2, :]
    h2 = jnp.maximum(h2, 0.0)

    # Layer 3: Linear(16, 1) as exact-f32 VPU multiply + lane reduce (no MXU
    # pass in the epilogue). W3^T is stored as row 0 of slab 2 (zero past col 15).
    w3_row = w_ref[2, 0:1, :]                                  # (1, F_PAD)
    b3 = b_ref[2:3, 0:1]                                       # (1, 1)
    y = jnp.sum(h2 * w3_row, axis=-1, keepdims=True) + b3
    out_ref[...] = y.astype(out_ref.dtype)


# ----------------------------------------------------------------------------
# Batch-tile selection: sized from a VMEM budget, capped for v7x megacore.
# ----------------------------------------------------------------------------
def _choose_batch_tile(B, d_in, itemsize, sub, *, vmem_budget=20 << 20, min_tiles=4):
    # Per batch row resident in VMEM:
    #   double-buffered x-tile row (d_in * itemsize bytes each) +
    #   double-buffered output row, lane-padded to 128 f32 lanes (512 B each).
    per_row = 2 * d_in * itemsize + 2 * 128 * 4
    tb = max(sub, (vmem_budget // per_row) // sub * sub)
    # v7x has 2 TensorCores: keep >= min_tiles grid steps when that still
    # leaves large tiles, so the "parallel" batch axis shards across cores.
    if B >= min_tiles * 2048:
        tb = min(tb, _round_up(pl.cdiv(B, min_tiles), sub))
    return max(sub, min(tb, _round_up(B, sub)))


# ----------------------------------------------------------------------------
# Wrapper: batch-gridded single pallas_call, no wrapper-side padding.
# ----------------------------------------------------------------------------
def unconstrained_net_forward(x, w_packed, b_packed, *, batch_tile=None,
                              vmem_budget=20 << 20):
    """x: (B, input_dim) f32 (or bf16). Returns (B, 1) f32."""
    B, d_in = x.shape
    assert 1 <= d_in <= F_PAD
    assert w_packed.shape == (N_SLABS, F_PAD, F_PAD)
    assert b_packed.shape == (N_SLABS, F_PAD)

    # Sublane granularity of the native tile for the x dtype.
    sub = {4: 8, 2: 16, 1: 32}.get(jnp.dtype(x.dtype).itemsize, 8)

    if batch_tile is None:
        tb = _choose_batch_tile(B, d_in, jnp.dtype(x.dtype).itemsize, sub,
                                vmem_budget=vmem_budget)
    else:
        tb = max(sub, batch_tile // sub * sub)
    tb = min(tb, _round_up(B, sub))

    grid = (pl.cdiv(B, tb),)
    kernel = functools.partial(_mlp_kernel, d_in=d_in)

    # Advisory cost estimate (memory-bound kernel; flops use padded widths).
    flops = 2 * B * (d_in * F_PAD + F_PAD * F_PAD + F_PAD)
    bytes_accessed = int(
        B * (d_in * jnp.dtype(x.dtype).itemsize + 4)
        + w_packed.size * jnp.dtype(w_packed.dtype).itemsize
        + b_packed.size * jnp.dtype(b_packed.dtype).itemsize)

    out = pl.pallas_call(
        kernel,
        out_shape=jax.ShapeDtypeStruct((B, 1), jnp.float32),
        grid=grid,
        in_specs=[
            # Tiled activations: one (tb, d_in) block per grid step; the
            # ragged final block (if any) is handled by masked boundary stores.
            pl.BlockSpec((tb, d_in), lambda i: (i, 0)),
            # Packed weights / biases: full blocks, same index every step
            # (resident across the grid, no per-step re-DMA).
            pl.BlockSpec((N_SLABS, F_PAD, F_PAD), lambda i: (0, 0, 0)),
            pl.BlockSpec((N_SLABS, F_PAD), lambda i: (0, 0)),
        ],
        out_specs=pl.BlockSpec((tb, 1), lambda i: (i, 0)),
        compiler_params=pltpu.CompilerParams(
            dimension_semantics=("parallel",),        # megacore-shardable on v7x
            vmem_limit_bytes=32 * 1024 * 1024),       # covers v5e's 16 MiB default
        cost_estimate=pl.CostEstimate(
            flops=flops, transcendentals=0, bytes_accessed=bytes_accessed),
    )(x, w_packed, b_packed)

    return out


# ----------------------------------------------------------------------------
# Parameter init mirroring the PyTorch module (xavier_uniform, zero biases),
# and packing into the kernel's fused layout (all float32, no quantization).
# ----------------------------------------------------------------------------
def init_params(key, input_dim, layer_dims):
    dims = [input_dim] + list(layer_dims) + [1]
    params = []
    for fan_in, fan_out in zip(dims[:-1], dims[1:]):
        key, sub = jax.random.split(key)
        bound = math.sqrt(6.0 / (fan_in + fan_out))          # xavier_uniform
        w = jax.random.uniform(sub, (fan_in, fan_out), jnp.float32,
                               minval=-bound, maxval=bound)  # stored (in, out)
        b = jnp.zeros((fan_out,), jnp.float32)
        params.append((w, b))
    return params


def pack_params(params):
    """Pack [(W1,b1),(W2,b2),(W3,b3)] into (3,32,32) f32 + (3,32) f32.

    Correctness of the fused kernel depends on the padded entries of W2, b2
    and the W3 row being exactly zero (ReLU'd padded lanes stay zero and the
    final lane reduce ignores them); this packer guarantees it.
    """
    (w1, b1), (w2, b2), (w3, b3) = params
    assert w1.shape[0] <= F_PAD and w1.shape[1] <= F_PAD
    assert w2.shape[0] <= F_PAD and w2.shape[1] <= F_PAD
    assert w3.shape[0] <= F_PAD and w3.shape[1] == 1

    W = jnp.zeros((N_SLABS, F_PAD, F_PAD), jnp.float32)
    W = W.at[0, :w1.shape[0], :w1.shape[1]].set(w1)
    W = W.at[1, :w2.shape[0], :w2.shape[1]].set(w2)
    W = W.at[2, 0, :w3.shape[0]].set(w3[:, 0])        # W3^T as row 0 of slab 2

    Bv = jnp.zeros((N_SLABS, F_PAD), jnp.float32)
    Bv = Bv.at[0, :b1.shape[0]].set(b1)
    Bv = Bv.at[1, :b2.shape[0]].set(b2)
    Bv = Bv.at[2, 0].set(b3[0])

    return W, Bv


def reference_forward(x, params):
    """Plain float32 JAX reference with the module's semantics
    (Linear -> ReLU -> Linear -> ReLU -> Linear)."""
    (w1, b1), (w2, b2), (w3, b3) = params
    x = x.astype(jnp.float32)
    h = jnp.maximum(x @ w1 + b1[None, :], 0.0)
    h = jnp.maximum(h @ w2 + b2[None, :], 0.0)
    return h @ w3 + b3[None, :]


if __name__ == "__main__":
    # Small shapes consistent with the module:
    #   batch=8, input_dim=32, layer_dims=[32, 16]
    batch, input_dim = 8, 32
    layer_dims = [32, 16]

    key = jax.random.PRNGKey(0)
    key_x, key_p, key_x2 = jax.random.split(key, 3)
    x = jax.random.normal(key_x, (batch, input_dim), jnp.float32)
    params = init_params(key_p, input_dim, layer_dims)
    w_packed, b_packed = pack_params(params)

    out = jax.block_until_ready(unconstrained_net_forward(x, w_packed, b_packed))
    ref = reference_forward(x, params)
    assert out.shape == (batch, 1)
    # Tolerance covers only the MXU's f32-input rounding (no parameter
    # quantization anywhere); in practice the difference is far smaller.
    assert bool(jnp.allclose(out, ref, atol=2e-3, rtol=2e-3)), (
        "mismatch vs f32 reference (small batch): "
        f"max abs err {float(jnp.max(jnp.abs(out - ref)))}")

    # Multi-tile path with a ragged final block (no wrapper-side padding):
    # B=3000, batch_tile=896 -> grid=4, last block has 312 valid rows.
    big_batch = 3000
    x_big = jax.random.normal(key_x2, (big_batch, input_dim), jnp.float32)
    out_big = jax.block_until_ready(
        unconstrained_net_forward(x_big, w_packed, b_packed, batch_tile=896))
    ref_big = reference_forward(x_big, params)
    assert out_big.shape == (big_batch, 1)
    assert bool(jnp.allclose(out_big, ref_big, atol=2e-3, rtol=2e-3)), (
        "mismatch vs f32 reference (tiled / ragged batch): "
        f"max abs err {float(jnp.max(jnp.abs(out_big - ref_big)))}")

    print("KERNEL_OK")
</pallas_src>

<mosaic_0001>
module attributes {stable_mosaic.version = 11 : i64} {
  func.func @_mlp_kernel(%arg0: i32, %arg1: memref<8x32xf32, #tpu.memory_space<vmem>>, %arg2: memref<3x32x32xf32, #tpu.memory_space<vmem>>, %arg3: memref<3x32xf32, #tpu.memory_space<vmem>>, %arg4: memref<8x1xf32, #tpu.memory_space<vmem>>) attributes {dimension_semantics = [#tpu.dimension_semantics<parallel>], iteration_bounds = array<i64: 1>, scalar_prefetch = 0 : i64, scratch_operands = 0 : i64, tpu.core_type = #tpu.core_type<tc>, window_params = [{transform_indices = @transform_0, window_bounds = array<i64: 8, 32>}, {pipeline_mode = #tpu.pipeline_mode<synchronous>, transform_indices = @transform_1, window_bounds = array<i64: 3, 32, 32>}, {pipeline_mode = #tpu.pipeline_mode<synchronous>, transform_indices = @transform_2, window_bounds = array<i64: 3, 32>}, {transform_indices = @transform_3, window_bounds = array<i64: 8, 1>}]} {
    %c0 = arith.constant 0 : index
    %c0_0 = arith.constant 0 : index
    %0 = vector.load %arg1[%c0, %c0_0] : memref<8x32xf32, #tpu.memory_space<vmem>>, vector<8x32xf32>
    %c0_1 = arith.constant 0 : index
    %c0_2 = arith.constant 0 : index
    %c0_3 = arith.constant 0 : index
    %1 = vector.load %arg2[%c0_1, %c0_2, %c0_3] : memref<3x32x32xf32, #tpu.memory_space<vmem>>, vector<1x32x32xf32>
    %2 = vector.shape_cast %1 : vector<1x32x32xf32> to vector<32x32xf32>
    %cst = arith.constant dense<0.000000e+00> : vector<8x32xf32>
    %3 = tpu.matmul %0, %2, %cst {dimension_numbers = #tpu.dot_dimension_numbers<[1], [0], [0], [1], [0, 0, 1, 1], [], []>} : vector<8x32xf32>, vector<32x32xf32>, vector<8x32xf32> -> vector<8x32xf32>
    %c0_4 = arith.constant 0 : index
    %c0_5 = arith.constant 0 : index
    %4 = vector.load %arg3[%c0_4, %c0_5] : memref<3x32xf32, #tpu.memory_space<vmem>>, vector<1x32xf32>
    %5 = vector.broadcast %4 : vector<1x32xf32> to vector<8x32xf32>
    %6 = arith.addf %3, %5 : vector<8x32xf32>
    %cst_6 = arith.constant 0.000000e+00 : f32
    %7 = vector.broadcast %cst_6 : f32 to vector<8x32xf32>
    %8 = arith.maximumf %6, %7 : vector<8x32xf32>
    %c1 = arith.constant 1 : index
    %c0_7 = arith.constant 0 : index
    %c0_8 = arith.constant 0 : index
    %9 = vector.load %arg2[%c1, %c0_7, %c0_8] : memref<3x32x32xf32, #tpu.memory_space<vmem>>, vector<1x32x32xf32>
    %10 = vector.shape_cast %9 : vector<1x32x32xf32> to vector<32x32xf32>
    %cst_9 = arith.constant dense<0.000000e+00> : vector<8x32xf32>
    %11 = tpu.matmul %8, %10, %cst_9 {dimension_numbers = #tpu.dot_dimension_numbers<[1], [0], [0], [1], [0, 0, 1, 1], [], []>} : vector<8x32xf32>, vector<32x32xf32>, vector<8x32xf32> -> vector<8x32xf32>
    %c1_10 = arith.constant 1 : index
    %c0_11 = arith.constant 0 : index
    %12 = vector.load %arg3[%c1_10, %c0_11] : memref<3x32xf32, #tpu.memory_space<vmem>>, vector<1x32xf32>
    %13 = vector.broadcast %12 : vector<1x32xf32> to vector<8x32xf32>
    %14 = arith.addf %11, %13 : vector<8x32xf32>
    %cst_12 = arith.constant 0.000000e+00 : f32
    %15 = vector.broadcast %cst_12 : f32 to vector<8x32xf32>
    %16 = arith.maximumf %14, %15 : vector<8x32xf32>
    %c2 = arith.constant 2 : index
    %c0_13 = arith.constant 0 : index
    %c0_14 = arith.constant 0 : index
    %17 = vector.load %arg2[%c2, %c0_13, %c0_14] : memref<3x32x32xf32, #tpu.memory_space<vmem>>, vector<1x1x32xf32>
    %18 = vector.shape_cast %17 : vector<1x1x32xf32> to vector<1x32xf32>
    %c2_15 = arith.constant 2 : index
    %c0_16 = arith.constant 0 : index
    %19 = vector.load %arg3[%c2_15, %c0_16] : memref<3x32xf32, #tpu.memory_space<vmem>>, vector<1x1xf32>
    %20 = vector.broadcast %18 : vector<1x32xf32> to vector<8x32xf32>
    %21 = arith.mulf %16, %20 : vector<8x32xf32>
    %cst_17 = arith.constant dense<0.000000e+00> : vector<8xf32>
    %22 = vector.multi_reduction <add>, %21, %cst_17 [1] : vector<8x32xf32> to vector<8xf32>
    %23 = vector.shape_cast %22 : vector<8xf32> to vector<8x1xf32>
    %24 = vector.broadcast %19 : vector<1x1xf32> to vector<8x1xf32>
    %25 = arith.addf %23, %24 : vector<8x1xf32>
    %c0_18 = arith.constant 0 : index
    %c0_19 = arith.constant 0 : index
    %26 = vector.load %arg4[%c0_18, %c0_19] : memref<8x1xf32, #tpu.memory_space<vmem>>, vector<8x1xf32>
    tpu.vector_store %arg4[%c0_18, %c0_19], %25 {strides = array<i32>} : memref<8x1xf32, #tpu.memory_space<vmem>>, vector<8x1xf32>,
    return
  }
  func.func @transform_0(%arg0: i32) -> (i32, i32) {
    %c0_i32 = arith.constant 0 : i32
    %c0_i32_0 = arith.constant 0 : i32
    return %arg0, %c0_i32 : i32, i32
  }
  func.func @transform_1(%arg0: i32) -> (i32, i32, i32) {
    %c0_i32 = arith.constant 0 : i32
    %c0_i32_0 = arith.constant 0 : i32
    %c0_i32_1 = arith.constant 0 : i32
    %c0_i32_2 = arith.constant 0 : i32
    return %c0_i32, %c0_i32_0, %c0_i32_1 : i32, i32, i32
  }
  func.func @transform_2(%arg0: i32) -> (i32, i32) {
    %c0_i32 = arith.constant 0 : i32
    %c0_i32_0 = arith.constant 0 : i32
    %c0_i32_1 = arith.constant 0 : i32
    return %c0_i32, %c0_i32_0 : i32, i32
  }
  func.func @transform_3(%arg0: i32) -> (i32, i32) {
    %c0_i32 = arith.constant 0 : i32
    %c0_i32_0 = arith.constant 0 : i32
    return %arg0, %c0_i32 : i32, i32
  }
}

</mosaic_0001>

<bundles_post_ra>
// kernel: tpu_custom_call.1
= control target key start
LH: loop header
LB: loop body
LE: loop exit
PB: predicated region body
PF: predicated region fallthrough
CT: control target
= control target key end

     0   :  { %8 = vsyncpa [#allocation3], 0  ;;  %s265_s0 = inlined_call_operand.hbm [shape: f32[8,32], index: 0, kind: input, shape index: {}]   ;;  %s266_s1 = inlined_call_operand.hbm [shape: f32[3,32,32], index: 1, kind: input, shape index: {}]   ;;  %s267_s2 = inlined_call_operand.hbm [shape: f32[3,32], index: 2, kind: input, shape index: {}]   ;;  %s268_s3 = inlined_call_operand.vmem [shape: f32[8,1], index: 3, kind: output, shape index: {}]  }
   0x1   :  { %9 = vsyncpa [#allocation5], 0  ;;  %s25_s14 = sshll.u32 %s266_s1, 4  ;;  %s225_s15 = smov [#allocation4]   ;;  %s26_s14 = int_to_ptr.hbm [resolvable:$true] %s25_s14 }
   0x2   :  { %s27_s16 = sshll.u32 %s225_s15, 4  ;;  %s15_s19 = sshll.u32 %s265_s0, 4  ;;  %s28_s16 = int_to_ptr.vmem [resolvable:$true] %s27_s16  ;;  %s16_s19 = int_to_ptr.hbm [resolvable:$true] %s15_s19 }
   0x3   :  { %s226_s20 = smov 128   ;;  %s227_s21 = smov 8  }
   0x4   :  { %33 = dma.hbm_to_vmem [thread:$0]  %s26_s14, 1536, %s28_s16, [#allocation5], %s226_s20, %s226_s20, %s227_s21  }
   0x5   :  { %s228_s22 = smov [#allocation2]   ;;  %s39_s26 = sshll.u32 %s267_s2, 4  ;;  %s40_s26 = int_to_ptr.hbm [resolvable:$true] %s39_s26 }
   0x6   :  { %s17_s23 = sshll.u32 %s228_s22, 4  ;;  %s229_s1 = smov [#allocation6]   ;;  %s18_s23 = int_to_ptr.vmem [resolvable:$true] %s17_s23 }
   0x7   :  { %20 = dma.hbm_to_vmem [thread:$0]  %s16_s19, 128, %s18_s23, [#allocation3]  }
   0x8   :  { %s41_s27 = sshll.u32 %s229_s1, 4  ;;  %s42_s27 = int_to_ptr.vmem [resolvable:$true] %s41_s27 }
   0x9   :  { %44 = dma.hbm_to_vmem [thread:$0]  %s40_s26, 64, %s42_s27, [#allocation5]  }
   0xa   :  { %221 = dma.done.wait [#allocation3], 128  }
   0xb   :  { %222 = vsyncadd [#allocation3], 4294967168 }
   0xc   :  { %223 = dma.done.wait [#allocation5], 1600  }
   0xd   :  { %224 = vsyncadd [#allocation5], 4294965696  ;;  %v61_v0 = vld [vmem:[#allocation4 + $0x18] sm:$0xff]  ;;  %v60_v1 = vld [vmem:[#allocation4 + $0x10] sm:$0xff]  ;;  %vm64_vm0 = vcmask 261120   ;;  %vm130_vm1 = vcmask 7168  }
   0xe   :  { %80 = vmatpush.msra.mxu0 %v61_v0  ;;  %v93_v2 = vld [vmem:[#allocation4 + $0x38] sm:$0xff]  ;;  %v59_v3 = vld [vmem:[#allocation4 + $0x8] sm:$0xff]  ;;  %v58_v4 = vld [vmem:[#allocation4] sm:$0xff] }
   0xf   :  { %111 = vmatpush.msra.mxu1 %v93_v2  ;;  %v57_v5 = vld [vmem:[#allocation2] sm:$0xff]  ;;  %v92_v6 = vld [vmem:[#allocation4 + $0x30] sm:$0xff]  ;;  %v91_v7 = vld [vmem:[#allocation4 + $0x28] sm:$0xff] }
  0x10   :  { %81 = vmatpush.msra.mxu0 %v60_v1  ;;  %v90_v8 = vld [vmem:[#allocation4 + $0x20] sm:$0xff] }
  0x11   :  { %112 = vmatpush.msra.mxu1 %v92_v6  ;;  %v145_v9 = vld [vmem:[#allocation6] ss:$0 sm:$0xff]  ;;  %v146_v13 = vld [vmem:[#allocation6 + $0x1] ss:$0 sm:$0xff]  ;;  %v148_v20 = vld [vmem:[#allocation6 + $0x2] ss:$0 sm:$0xff] }
  0x12   :  { %82 = vmatpush.msra.mxu0 %v59_v3  ;;  %v147_v16 = vld [vmem:[#allocation4 + $0x40] ss:$0 sm:$0xff] }
  0x13   :  { %113 = vmatpush.msra.mxu1 %v91_v7 }
  0x14   :  { %83 = vmatpush.msra.mxu0 %v58_v4 }
  0x15   :  { %138 = vmatmul.msk.f32.vlgmr.msra.gmra.mxu0 %vm64_vm0, %v57_v5  ;;  %114 = vmatpush.msra.mxu1 %v90_v8 }
  0x92   :  { %v85_v10 = vpop.f32.mrf.mxu0 }
  0x93   :  { %v86_v11 = vadd.f32 %v145_v9, %v85_v10 }
  0x95   :  { %v88_v12 = vmax.f32 %v86_v11, 0.0 }
  0x97   :  { %139 = vmatmul.msk.f32.vlgmr.msra.gmra.mxu1 %vm64_vm0, %v88_v12 }
 0x114   :  { %v116_v14 = vpop.f32.mrf.mxu1 }
 0x115   :  { %v117_v15 = vadd.f32 %v146_v13, %v116_v14 }
 0x117   :  { %v119_v17 = vmax.f32 %v117_v15, 0.0 }
 0x119   :  { %v124_v18 = vmul.f32 %v147_v16, %v119_v17 }
 0x11b   :  { %v125_v19 = vsel %vm64_vm0, %v124_v18, 0.0 }
 0x11c   :  { %126 = vadd.xlane.f32.xlu0 %v125_v19 }
 0x18f   :  { %v127_v21 = vpop.xlane.xlu0 %126 }
 0x190   :  { %v129_v22 = vadd.f32 %v148_v20, %v127_v21 }
 0x192   :  { %131 = vst.msk [vmem:[%s268_s3] sm:$0xff] %vm130_vm1, %v129_v22 }
 0x193   :  { %136 = vsyncpa [#allocation3], 1 }
 0x194   :  { %137 = vsyncpa [#allocation5], 1 }

</bundles_post_ra>
